<compile_context>
chip_gen: v7x
topology: tpu7x:2x2x1
jax: 0.10.0
libtpu: 0.0.40
codegen_flags: <defaults>
</compile_context>

<pallas_src>
import jax
import jax.numpy as jnp
from jax.experimental import pallas as pl
from jax.experimental.pallas import tpu as pltpu

BN_EPS = 1e-5

# model dims after host-side folding of back-to-back Linears
D_IN, D_MID, D_OUT = 3, 5, 5       # x(.,3) @ W12(3,5) -> BN(5) -> @ W34(5,5)

_MIN_TILE = 1024                   # 8 sublanes x 128 lanes
_MAX_TILE = 131072                 # ~1.5 MiB x-tile + 2.5 MiB out-tile per step


# --------------------------------------------------------------------------------------
# kernels
# --------------------------------------------------------------------------------------
def _stats_kernel(p_ref, x_ref, part_ref):
    """Per-tile partial sums of z = x @ W12 and z*z (per BN feature).

    x_ref:    VMEM (D_IN, sub_t, 128)  - lane-dense batch tile
    p_ref:    SMEM (15,) f32           - W12 row-major (in, out)
    part_ref: VMEM (2, D_MID, 128)     - [0]=partial sum(z), [1]=partial sum(z*z),
                                         reduced over sublanes only (lanes reduced
                                         on the host).  Zero-padded batch rows
                                         contribute exactly 0 (no bias added here).
    """
    x0 = x_ref[0]                                       # (sub_t, 128)
    x1 = x_ref[1]
    x2 = x_ref[2]
    sums = []
    sqs = []
    for f in range(D_MID):
        z = (x0 * p_ref[f]
             + x1 * p_ref[D_MID + f]
             + x2 * p_ref[2 * D_MID + f])               # scalar x vreg splat FMAs
        sums.append(jnp.sum(z, axis=0, keepdims=True))  # (1, 128)
        sqs.append(jnp.sum(z * z, axis=0, keepdims=True))
    part_ref[0] = jnp.concatenate(sums, axis=0)         # (D_MID, 128)
    part_ref[1] = jnp.concatenate(sqs, axis=0)


def _apply_kernel(p_ref, x_ref, out_ref):
    """out = x @ Weff + beff  (BN and the last two Linears folded into Weff/beff).

    x_ref:   VMEM (D_IN, sub_t, 128)
    p_ref:   SMEM (20,) f32  - Weff row-major (3,5) then beff (5,)
    out_ref: VMEM (D_OUT, sub_t, 128)  - fully lane-dense, unmasked stores
    """
    x0 = x_ref[0]
    x1 = x_ref[1]
    x2 = x_ref[2]
    for f in range(D_OUT):
        out_ref[f] = (x0 * p_ref[f]
                      + x1 * p_ref[D_OUT + f]
                      + x2 * p_ref[2 * D_OUT + f]
                      + p_ref[3 * D_OUT + f])


# --------------------------------------------------------------------------------------
# host-side helpers
# --------------------------------------------------------------------------------------
def _fold_params(params):
    """Fold Linear1∘Linear2 and Linear3∘Linear4 into (in, out)-layout affines."""
    w12 = (params["w2"] @ params["w1"]).T.astype(jnp.float32)                # (3, 5)
    b12 = (params["w2"] @ params["b1"] + params["b2"]).astype(jnp.float32)   # (5,)
    w34 = (params["w4"] @ params["w3"]).T.astype(jnp.float32)                # (5, 5)
    b34 = (params["w4"] @ params["b3"] + params["b4"]).astype(jnp.float32)   # (5,)
    return w12, b12, w34, b34


def _pick_batch_tile(batch):
    tile = _MIN_TILE
    while tile < _MAX_TILE and tile < batch:
        tile *= 2
    return tile


# --------------------------------------------------------------------------------------
# public forward
# --------------------------------------------------------------------------------------
def model_forward(x, params, *, batch_tile=None):
    """x: (B, 3) float. params: dict of the original (unfused) weights/biases."""
    B = x.shape[0]
    assert x.shape[1] == D_IN, x.shape

    w12, b12, w34, b34 = _fold_params(params)
    gamma = params["gamma"].astype(jnp.float32)
    beta = params["beta"].astype(jnp.float32)

    if batch_tile is None:
        batch_tile = _pick_batch_tile(B)
    assert batch_tile % _MIN_TILE == 0, batch_tile

    n_tiles = -(-B // batch_tile)            # cdiv
    b_pad = n_tiles * batch_tile
    sub_t = batch_tile // 128

    # lane-dense relayout (wrapper-side layout plumbing): (B,3) -> (3, b_pad/128, 128)
    x32 = x.astype(jnp.float32)
    if b_pad != B:
        x32 = jnp.pad(x32, ((0, b_pad - B), (0, 0)))
    x_t = x32.T.reshape(D_IN, b_pad // 128, 128)

    smem = pl.BlockSpec(memory_space=pltpu.MemorySpace.SMEM)
    x_spec = pl.BlockSpec((D_IN, sub_t, 128), lambda i: (0, i, 0))

    # ---- pass 1: per-tile partial batch statistics of z = x @ W12 ------------------
    p1 = w12.reshape(-1)                                                     # (15,)
    partials = pl.pallas_call(
        _stats_kernel,
        out_shape=jax.ShapeDtypeStruct((2 * n_tiles, D_MID, 128), jnp.float32),
        grid=(n_tiles,),
        in_specs=[smem, x_spec],
        out_specs=pl.BlockSpec((2, D_MID, 128), lambda i: (i, 0, 0)),
        compiler_params=pltpu.CompilerParams(dimension_semantics=("parallel",)),
    )(p1, x_t)

    # tiny host reduction + BN fold (training-mode biased batch statistics)
    tot = jnp.sum(partials.reshape(n_tiles, 2, D_MID, 128), axis=(0, 3))     # (2, 5)
    mean_z = tot[0] / B
    var = jnp.maximum(tot[1] / B - mean_z * mean_z, 0.0)   # bias cancels in variance
    mean = mean_z + b12
    s = gamma * jax.lax.rsqrt(var + BN_EPS)
    w_eff = (w12 * s[None, :]) @ w34                                         # (3, 5)
    b_eff = ((b12 - mean) * s + beta) @ w34 + b34                            # (5,)
    p2 = jnp.concatenate([w_eff.reshape(-1), b_eff])                         # (20,)

    # ---- pass 2: out = x @ Weff + beff ----------------------------------------------
    out_t = pl.pallas_call(
        _apply_kernel,
        out_shape=jax.ShapeDtypeStruct((D_OUT, b_pad // 128, 128), jnp.float32),
        grid=(n_tiles,),
        in_specs=[smem, x_spec],
        out_specs=pl.BlockSpec((D_OUT, sub_t, 128), lambda i: (0, i, 0)),
        compiler_params=pltpu.CompilerParams(dimension_semantics=("parallel",)),
    )(p2, x_t)

    out = out_t.reshape(D_OUT, b_pad).T                                      # (b_pad, 5)
    return out[:B] if b_pad != B else out


# --------------------------------------------------------------------------------------
# params / reference
# --------------------------------------------------------------------------------------
def init_params(key):
    """Deterministic synthetic parameters matching the PyTorch module's shapes."""
    ks = jax.random.split(key, 8)

    def linear(kw, kb, out_dim, in_dim):
        bound = 1.0 / jnp.sqrt(jnp.float32(in_dim))
        w = jax.random.uniform(kw, (out_dim, in_dim), jnp.float32, -bound, bound)
        b = jax.random.uniform(kb, (out_dim,), jnp.float32, -bound, bound)
        return w, b

    w1, b1 = linear(ks[0], ks[1], 4, 3)
    w2, b2 = linear(ks[2], ks[3], 5, 4)
    w3, b3 = linear(ks[4], ks[5], 6, 5)
    w4, b4 = linear(ks[6], ks[7], 5, 6)
    gamma = jnp.ones((5,), jnp.float32)    # BatchNorm1d affine init
    beta = jnp.zeros((5,), jnp.float32)
    return dict(w1=w1, b1=b1, w2=w2, b2=b2, gamma=gamma, beta=beta,
                w3=w3, b3=b3, w4=w4, b4=b4)


def _reference(x, p):
    """Pure-JAX reference (unfused, mirrors the PyTorch module op-by-op)."""
    h = x @ p["w1"].T + p["b1"]
    h = h @ p["w2"].T + p["b2"]
    mean = h.mean(axis=0, keepdims=True)
    var = ((h - mean) ** 2).mean(axis=0, keepdims=True)
    h = (h - mean) / jnp.sqrt(var + BN_EPS) * p["gamma"] + p["beta"]
    h = h @ p["w3"].T + p["b3"]
    h = h @ p["w4"].T + p["b4"]
    return h
    # TODO(synk): BatchNorm1d running_mean/running_var state updates are not produced
    # (forward-output parity only, training-mode batch statistics).


if __name__ == "__main__":
    key = jax.random.PRNGKey(0)
    kx, kp, kx2 = jax.random.split(key, 3)
    params = init_params(kp)

    # small batch (original test scale): single tile, padded to 1024 lane-dense rows
    B = 8
    x = jax.random.normal(kx, (B, D_IN), jnp.float32)
    out = jax.block_until_ready(model_forward(x, params))
    ref = _reference(x, params)
    assert out.shape == (B, D_OUT)
    err = float(jnp.max(jnp.abs(out - ref)))
    assert jnp.allclose(out, ref, atol=2e-4, rtol=2e-4), f"small-batch max abs err {err}"

    # irregular batch (not a multiple of 8/128): multi-tile grid + zero padding
    B2 = 3000
    x2 = jax.random.normal(kx2, (B2, D_IN), jnp.float32)
    out2 = jax.block_until_ready(model_forward(x2, params, batch_tile=1024))
    ref2 = _reference(x2, params)
    assert out2.shape == (B2, D_OUT)
    err2 = float(jnp.max(jnp.abs(out2 - ref2)))
    assert jnp.allclose(out2, ref2, atol=2e-4, rtol=2e-4), f"gridded max abs err {err2}"

    print("KERNEL_OK")
</pallas_src>

<mosaic_0001>
module attributes {stable_mosaic.version = 11 : i64} {
  func.func @_stats_kernel(%arg0: i32, %arg1: memref<15xf32, #tpu.memory_space<smem>>, %arg2: memref<3x8x128xf32, #tpu.memory_space<vmem>>, %arg3: memref<2x5x128xf32, #tpu.memory_space<vmem>>) attributes {dimension_semantics = [#tpu.dimension_semantics<parallel>], iteration_bounds = array<i64: 1>, scalar_prefetch = 0 : i64, scratch_operands = 0 : i64, tpu.core_type = #tpu.core_type<tc>, window_params = [{transform_indices = @transform_0, window_bounds = array<i64: 15>}, {transform_indices = @transform_1, window_bounds = array<i64: 3, 8, 128>}, {transform_indices = @transform_2, window_bounds = array<i64: 2, 5, 128>}]} {
    %c0 = arith.constant 0 : index
    %c0_0 = arith.constant 0 : index
    %c0_1 = arith.constant 0 : index
    %0 = vector.load %arg2[%c0, %c0_0, %c0_1] : memref<3x8x128xf32, #tpu.memory_space<vmem>>, vector<1x8x128xf32>
    %1 = vector.shape_cast %0 : vector<1x8x128xf32> to vector<8x128xf32>
    %c1 = arith.constant 1 : index
    %c0_2 = arith.constant 0 : index
    %c0_3 = arith.constant 0 : index
    %2 = vector.load %arg2[%c1, %c0_2, %c0_3] : memref<3x8x128xf32, #tpu.memory_space<vmem>>, vector<1x8x128xf32>
    %3 = vector.shape_cast %2 : vector<1x8x128xf32> to vector<8x128xf32>
    %c2 = arith.constant 2 : index
    %c0_4 = arith.constant 0 : index
    %c0_5 = arith.constant 0 : index
    %4 = vector.load %arg2[%c2, %c0_4, %c0_5] : memref<3x8x128xf32, #tpu.memory_space<vmem>>, vector<1x8x128xf32>
    %5 = vector.shape_cast %4 : vector<1x8x128xf32> to vector<8x128xf32>
    %c0_6 = arith.constant 0 : index
    %6 = memref.load %arg1[%c0_6] : memref<15xf32, #tpu.memory_space<smem>>
    %7 = vector.broadcast %6 : f32 to vector<8x128xf32>
    %8 = arith.mulf %1, %7 : vector<8x128xf32>
    %c5 = arith.constant 5 : index
    %9 = memref.load %arg1[%c5] : memref<15xf32, #tpu.memory_space<smem>>
    %10 = vector.broadcast %9 : f32 to vector<8x128xf32>
    %11 = arith.mulf %3, %10 : vector<8x128xf32>
    %12 = arith.addf %8, %11 : vector<8x128xf32>
    %c10 = arith.constant 10 : index
    %13 = memref.load %arg1[%c10] : memref<15xf32, #tpu.memory_space<smem>>
    %14 = vector.broadcast %13 : f32 to vector<8x128xf32>
    %15 = arith.mulf %5, %14 : vector<8x128xf32>
    %16 = arith.addf %12, %15 : vector<8x128xf32>
    %cst = arith.constant dense<0.000000e+00> : vector<128xf32>
    %17 = vector.multi_reduction <add>, %16, %cst [0] : vector<8x128xf32> to vector<128xf32>
    %18 = vector.shape_cast %17 : vector<128xf32> to vector<1x128xf32>
    %19 = arith.mulf %16, %16 : vector<8x128xf32>
    %cst_7 = arith.constant dense<0.000000e+00> : vector<128xf32>
    %20 = vector.multi_reduction <add>, %19, %cst_7 [0] : vector<8x128xf32> to vector<128xf32>
    %21 = vector.shape_cast %20 : vector<128xf32> to vector<1x128xf32>
    %c1_8 = arith.constant 1 : index
    %22 = memref.load %arg1[%c1_8] : memref<15xf32, #tpu.memory_space<smem>>
    %23 = vector.broadcast %22 : f32 to vector<8x128xf32>
    %24 = arith.mulf %1, %23 : vector<8x128xf32>
    %c6 = arith.constant 6 : index
    %25 = memref.load %arg1[%c6] : memref<15xf32, #tpu.memory_space<smem>>
    %26 = vector.broadcast %25 : f32 to vector<8x128xf32>
    %27 = arith.mulf %3, %26 : vector<8x128xf32>
    %28 = arith.addf %24, %27 : vector<8x128xf32>
    %c11 = arith.constant 11 : index
    %29 = memref.load %arg1[%c11] : memref<15xf32, #tpu.memory_space<smem>>
    %30 = vector.broadcast %29 : f32 to vector<8x128xf32>
    %31 = arith.mulf %5, %30 : vector<8x128xf32>
    %32 = arith.addf %28, %31 : vector<8x128xf32>
    %cst_9 = arith.constant dense<0.000000e+00> : vector<128xf32>
    %33 = vector.multi_reduction <add>, %32, %cst_9 [0] : vector<8x128xf32> to vector<128xf32>
    %34 = vector.shape_cast %33 : vector<128xf32> to vector<1x128xf32>
    %35 = arith.mulf %32, %32 : vector<8x128xf32>
    %cst_10 = arith.constant dense<0.000000e+00> : vector<128xf32>
    %36 = vector.multi_reduction <add>, %35, %cst_10 [0] : vector<8x128xf32> to vector<128xf32>
    %37 = vector.shape_cast %36 : vector<128xf32> to vector<1x128xf32>
    %c2_11 = arith.constant 2 : index
    %38 = memref.load %arg1[%c2_11] : memref<15xf32, #tpu.memory_space<smem>>
    %39 = vector.broadcast %38 : f32 to vector<8x128xf32>
    %40 = arith.mulf %1, %39 : vector<8x128xf32>
    %c7 = arith.constant 7 : index
    %41 = memref.load %arg1[%c7] : memref<15xf32, #tpu.memory_space<smem>>
    %42 = vector.broadcast %41 : f32 to vector<8x128xf32>
    %43 = arith.mulf %3, %42 : vector<8x128xf32>
    %44 = arith.addf %40, %43 : vector<8x128xf32>
    %c12 = arith.constant 12 : index
    %45 = memref.load %arg1[%c12] : memref<15xf32, #tpu.memory_space<smem>>
    %46 = vector.broadcast %45 : f32 to vector<8x128xf32>
    %47 = arith.mulf %5, %46 : vector<8x128xf32>
    %48 = arith.addf %44, %47 : vector<8x128xf32>
    %cst_12 = arith.constant dense<0.000000e+00> : vector<128xf32>
    %49 = vector.multi_reduction <add>, %48, %cst_12 [0] : vector<8x128xf32> to vector<128xf32>
    %50 = vector.shape_cast %49 : vector<128xf32> to vector<1x128xf32>
    %51 = arith.mulf %48, %48 : vector<8x128xf32>
    %cst_13 = arith.constant dense<0.000000e+00> : vector<128xf32>
    %52 = vector.multi_reduction <add>, %51, %cst_13 [0] : vector<8x128xf32> to vector<128xf32>
    %53 = vector.shape_cast %52 : vector<128xf32> to vector<1x128xf32>
    %c3 = arith.constant 3 : index
    %54 = memref.load %arg1[%c3] : memref<15xf32, #tpu.memory_space<smem>>
    %55 = vector.broadcast %54 : f32 to vector<8x128xf32>
    %56 = arith.mulf %1, %55 : vector<8x128xf32>
    %c8 = arith.constant 8 : index
    %57 = memref.load %arg1[%c8] : memref<15xf32, #tpu.memory_space<smem>>
    %58 = vector.broadcast %57 : f32 to vector<8x128xf32>
    %59 = arith.mulf %3, %58 : vector<8x128xf32>
    %60 = arith.addf %56, %59 : vector<8x128xf32>
    %c13 = arith.constant 13 : index
    %61 = memref.load %arg1[%c13] : memref<15xf32, #tpu.memory_space<smem>>
    %62 = vector.broadcast %61 : f32 to vector<8x128xf32>
    %63 = arith.mulf %5, %62 : vector<8x128xf32>
    %64 = arith.addf %60, %63 : vector<8x128xf32>
    %cst_14 = arith.constant dense<0.000000e+00> : vector<128xf32>
    %65 = vector.multi_reduction <add>, %64, %cst_14 [0] : vector<8x128xf32> to vector<128xf32>
    %66 = vector.shape_cast %65 : vector<128xf32> to vector<1x128xf32>
    %67 = arith.mulf %64, %64 : vector<8x128xf32>
    %cst_15 = arith.constant dense<0.000000e+00> : vector<128xf32>
    %68 = vector.multi_reduction <add>, %67, %cst_15 [0] : vector<8x128xf32> to vector<128xf32>
    %69 = vector.shape_cast %68 : vector<128xf32> to vector<1x128xf32>
    %c4 = arith.constant 4 : index
    %70 = memref.load %arg1[%c4] : memref<15xf32, #tpu.memory_space<smem>>
    %71 = vector.broadcast %70 : f32 to vector<8x128xf32>
    %72 = arith.mulf %1, %71 : vector<8x128xf32>
    %c9 = arith.constant 9 : index
    %73 = memref.load %arg1[%c9] : memref<15xf32, #tpu.memory_space<smem>>
    %74 = vector.broadcast %73 : f32 to vector<8x128xf32>
    %75 = arith.mulf %3, %74 : vector<8x128xf32>
    %76 = arith.addf %72, %75 : vector<8x128xf32>
    %c14 = arith.constant 14 : index
    %77 = memref.load %arg1[%c14] : memref<15xf32, #tpu.memory_space<smem>>
    %78 = vector.broadcast %77 : f32 to vector<8x128xf32>
    %79 = arith.mulf %5, %78 : vector<8x128xf32>
    %80 = arith.addf %76, %79 : vector<8x128xf32>
    %cst_16 = arith.constant dense<0.000000e+00> : vector<128xf32>
    %81 = vector.multi_reduction <add>, %80, %cst_16 [0] : vector<8x128xf32> to vector<128xf32>
    %82 = vector.shape_cast %81 : vector<128xf32> to vector<1x128xf32>
    %83 = arith.mulf %80, %80 : vector<8x128xf32>
    %cst_17 = arith.constant dense<0.000000e+00> : vector<128xf32>
    %84 = vector.multi_reduction <add>, %83, %cst_17 [0] : vector<8x128xf32> to vector<128xf32>
    %85 = vector.shape_cast %84 : vector<128xf32> to vector<1x128xf32>
    %86 = tpu.concatenate %18, %34, %50, %66, %82 in 0 : vector<1x128xf32>, vector<1x128xf32>, vector<1x128xf32>, vector<1x128xf32>, vector<1x128xf32> -> vector<5x128xf32>
    %c0_18 = arith.constant 0 : index
    %c0_19 = arith.constant 0 : index
    %c0_20 = arith.constant 0 : index
    %87 = vector.load %arg3[%c0_18, %c0_19, %c0_20] : memref<2x5x128xf32, #tpu.memory_space<vmem>>, vector<1x5x128xf32>
    %88 = vector.shape_cast %87 : vector<1x5x128xf32> to vector<5x128xf32>
    %89 = vector.shape_cast %86 : vector<5x128xf32> to vector<1x5x128xf32>
    tpu.vector_store %arg3[%c0_18, %c0_19, %c0_20], %89 {strides = array<i32>} : memref<2x5x128xf32, #tpu.memory_space<vmem>>, vector<1x5x128xf32>,
    %90 = tpu.concatenate %21, %37, %53, %69, %85 in 0 : vector<1x128xf32>, vector<1x128xf32>, vector<1x128xf32>, vector<1x128xf32>, vector<1x128xf32> -> vector<5x128xf32>
    %c1_21 = arith.constant 1 : index
    %c0_22 = arith.constant 0 : index
    %c0_23 = arith.constant 0 : index
    %91 = vector.load %arg3[%c1_21, %c0_22, %c0_23] : memref<2x5x128xf32, #tpu.memory_space<vmem>>, vector<1x5x128xf32>
    %92 = vector.shape_cast %91 : vector<1x5x128xf32> to vector<5x128xf32>
    %93 = vector.shape_cast %90 : vector<5x128xf32> to vector<1x5x128xf32>
    tpu.vector_store %arg3[%c1_21, %c0_22, %c0_23], %93 {strides = array<i32>} : memref<2x5x128xf32, #tpu.memory_space<vmem>>, vector<1x5x128xf32>,
    return
  }
  func.func @transform_0(%arg0: i32) -> i32 {
    %c0_i32 = arith.constant 0 : i32
    %c0_i32_0 = arith.constant 0 : i32
    return %c0_i32 : i32
  }
  func.func @transform_1(%arg0: i32) -> (i32, i32, i32) {
    %c0_i32 = arith.constant 0 : i32
    %c0_i32_0 = arith.constant 0 : i32
    %c0_i32_1 = arith.constant 0 : i32
    return %c0_i32, %arg0, %c0_i32_0 : i32, i32, i32
  }
  func.func @transform_2(%arg0: i32) -> (i32, i32, i32) {
    %c0_i32 = arith.constant 0 : i32
    %c0_i32_0 = arith.constant 0 : i32
    %c0_i32_1 = arith.constant 0 : i32
    return %arg0, %c0_i32, %c0_i32_0 : i32, i32, i32
  }
}

</mosaic_0001>

<bundles_post_ra>
// kernel: tpu_custom_call.1
= control target key start
LH: loop header
LB: loop body
LE: loop exit
PB: predicated region body
PF: predicated region fallthrough
CT: control target
= control target key end

     0   :  { %7 = vsyncpa [#allocation4], 0  ;;  %s316_s0 = inlined_call_operand.hbm [shape: f32[15], index: 0, kind: input, shape index: {}]   ;;  %s317_s1 = inlined_call_operand.hbm [shape: f32[3,8,128], index: 1, kind: input, shape index: {}]   ;;  %s318_s2 = inlined_call_operand.vmem [shape: f32[2,5,128], index: 2, kind: output, shape index: {}]  }
   0x1   :  { %8 = vsyncpa [#allocation3], 0  ;;  %s201_s11 = scalar_lea.hbm %s316_s0, 16 }
   0x2   :  { %p202_p0 = scmp.ne.s32.totalorder %s316_s0, %s201_s11  ;;  %p205_p1 = scmp.lt.u32.totalorder %s201_s11, %s316_s0 }
   0x4   :  { %p207_p2 = pnand %p205_p1, %p202_p0 }
   0x6   :  { %210 = shalt.err (!%p207_p2)
}
   0x7   :  { %s237_s16 = smov [#allocation2]   ;;  %s238_s19 = smov [#allocation5]  }
   0x8   :  { %16 = dma.hbm_to_smem %s316_s0, 16, %s237_s16, [#allocation4]  }
   0x9   :  { %s22_s20 = sshll.u32 %s238_s19, 4  ;;  %s211_s23 = scalar_lea.hbm %s317_s1, 384  ;;  %s23_s20 = int_to_ptr.vmem [resolvable:$true] %s22_s20 }
   0xa   :  { %p212_p3 = scmp.ne.s32.totalorder %s317_s1, %s211_s23  ;;  %p215_p4 = scmp.lt.u32.totalorder %s211_s23, %s317_s1 }
   0xc   :  { %p217_p5 = pnand %p215_p4, %p212_p3 }
   0xe   :  { %220 = shalt.err (!%p217_p5)
}
   0xf   :  { %s221_s28 = scalar_lea.vmem %s23_s20, 384  ;;  %p226_p7 = scmp.lt.s32.totalorder %s23_s20, %s23_s20 }
  0x10   :  { %p222_p6 = scmp.ne.s32.totalorder %s23_s20, %s221_s28  ;;  %p227_p8 = scmp.lt.s32.totalorder %s221_s28, %s221_s28 }
  0x12   :  { %p228_p9 = por %p227_p8, %p226_p7 }
  0x14   :  { %p229_p10 = pnand %p228_p9, %p222_p6 }
  0x16   :  { %232 = shalt.err (!%p229_p10)
}
  0x17   :  { %s239_s0 = smov 128   ;;  %s240_s29 = smov 8  }
  0x18   :  { %28 = dma.hbm_to_vmem [thread:$0]  %s317_s1, 384, %s23_s20, [#allocation3], %s239_s0, %s239_s0, %s240_s29  }
  0x19   :  { %233 = dma.done.wait [#allocation4], 16  }
  0x1a   :  { %234 = vsyncadd [#allocation4], 4294967280 }
  0x1b   :  { %235 = dma.done.wait [#allocation3], 384  }
  0x1c   :  { %236 = vsyncadd [#allocation3], 4294966912 }
  0x1d   :  { %35 = sfence }
  0x1e   :  { %s41_s4 = sld [smem:[#allocation2]]  ;;  %s182_s5 = sld [smem:[#allocation2 + $0x5]]  ;;  %v280_v0 = vld [vmem:[#allocation5] sm:$0xff]  ;;  %v282_v1 = vld [vmem:[#allocation5 + $0x8] sm:$0xff]  ;;  %v284_v2 = vld [vmem:[#allocation5 + $0x10] sm:$0xff]  ;;  %vm161_vm0 = vcmask 1040384  }
  0x1f   :  { %s183_s6 = sld [smem:[#allocation2 + $0xa]]  ;;  %s184_s7 = sld [smem:[#allocation2 + $0x1]]  ;;  %vm163_vm1 = vcmask 1041408   ;;  %vm165_vm2 = vcmask 1042432   ;;  %vm167_vm3 = vcmask 1043456  }
  0x20   :  { %s185_s8 = sld [smem:[#allocation2 + $0x6]]  ;;  %s186_s9 = sld [smem:[#allocation2 + $0xb]] }
  0x21   :  { %s187_s10 = sld [smem:[#allocation2 + $0x2]]  ;;  %s188_s11 = sld [smem:[#allocation2 + $0x7]] }
  0x22   :  { %s189_s12 = sld [smem:[#allocation2 + $0xc]]  ;;  %s190_s1 = sld [smem:[#allocation2 + $0x3]] }
  0x23   :  { %s191_s13 = sld [smem:[#allocation2 + $0x8]]  ;;  %s286_s14 = sld [smem:[#allocation2 + $0xd]] }
  0x24   :  { %v42_v3 = vstv %s41_s4  ;;  %v45_v5 = vstv %s182_s5  ;;  %s291_s15 = sld [smem:[#allocation2 + $0x4]]  ;;  %s297_s16 = sld [smem:[#allocation2 + $0x9]] }
  0x25   :  { %v43_v4 = vmul.f32 %v42_v3, %v280_v0  ;;  %v49_v6 = vstv %s183_s6  ;;  %v46_v7 = vmul.f32 %v45_v5, %v282_v1  ;;  %v66_v9 = vstv %s184_s7  ;;  %s195_s17 = sld [smem:[#allocation2 + $0xe]] }
  0x26   :  { %v50_v8 = vmul.f32 %v49_v6, %v284_v2  ;;  %v69_v10 = vstv %s185_s8  ;;  %v67_v11 = vmul.f32 %v66_v9, %v280_v0  ;;  %v73_v13 = vstv %s186_s9 }
  0x27   :  { %v70_v12 = vmul.f32 %v69_v10, %v282_v1  ;;  %v90_v14 = vstv %s187_s10  ;;  %v47_v15 = vadd.f32 %v46_v7, %v43_v4  ;;  %v74_v16 = vmul.f32 %v73_v13, %v284_v2 }
  0x28   :  { %v91_v17 = vmul.f32 %v90_v14, %v280_v0  ;;  %v93_v18 = vstv %s188_s11  ;;  %v97_v21 = vstv %s189_s12  ;;  %v114_v22 = vstv %s190_s1 }
  0x29   :  { %v71_v19 = vadd.f32 %v70_v12, %v67_v11  ;;  %v94_v20 = vmul.f32 %v93_v18, %v282_v1  ;;  %v51_v23 = vadd.f32 %v50_v8, %v47_v15  ;;  %v98_v24 = vmul.f32 %v97_v21, %v284_v2 }
  0x2a   :  { %v115_v25 = vmul.f32 %v114_v22, %v280_v0  ;;  %v117_v26 = vstv %s191_s13  ;;  %v121_v30 = vstv %s286_s14  ;;  %v138_v40 = vstv %s291_s15 }
  0x2b   :  { %v75_v27 = vadd.f32 %v74_v16, %v71_v19  ;;  %v95_v28 = vadd.f32 %v94_v20, %v91_v17  ;;  %v118_v29 = vmul.f32 %v117_v26, %v282_v1  ;;  %v52_v31 = vrot.slane %v51_v23, 4 }
  0x2c   :  { %v58_v32 = vmul.f32 %v51_v23, %v51_v23  ;;  %v122_v33 = vmul.f32 %v121_v30, %v284_v2  ;;  %v141_v48 = vstv %s297_s16  ;;  %v139_v58 = vmul.f32 %v138_v40, %v280_v0 }
  0x2d   :  { %v76_v34 = vrot.slane %v75_v27, 4  ;;  %v82_v35 = vmul.f32 %v75_v27, %v75_v27  ;;  %v99_v36 = vadd.f32 %v98_v24, %v95_v28  ;;  %v119_v37 = vadd.f32 %v118_v29, %v115_v25 }
  0x2e   :  { %v53_v38 = vadd.f32 %v52_v31, %v51_v23  ;;  %v59_v39 = vrot.slane %v58_v32, 4  ;;  %v142_v62 = vmul.f32 %v141_v48, %v282_v1  ;;  %v145_v14 = vstv %s195_s17 }
  0x2f   :  { %v77_v41 = vadd.f32 %v76_v34, %v75_v27  ;;  %v83_v42 = vrot.slane %v82_v35, 4  ;;  %v100_v43 = vrot.slane %v99_v36, 4  ;;  %v106_v44 = vmul.f32 %v99_v36, %v99_v36 }
  0x30   :  { %v54_v45 = vrot.slane %v53_v38, 2  ;;  %v60_v46 = vadd.f32 %v59_v39, %v58_v32  ;;  %v123_v47 = vadd.f32 %v122_v33, %v119_v37  ;;  %v143_v10 = vadd.f32 %v142_v62, %v139_v58 }
  0x31   :  { %v78_v49 = vrot.slane %v77_v41, 2  ;;  %v84_v50 = vadd.f32 %v83_v42, %v82_v35  ;;  %v101_v51 = vadd.f32 %v100_v43, %v99_v36  ;;  %v107_v52 = vrot.slane %v106_v44, 4 }
  0x32   :  { %v124_v53 = vrot.slane %v123_v47, 4  ;;  %v130_v54 = vmul.f32 %v123_v47, %v123_v47  ;;  %v61_v55 = vrot.slane %v60_v46, 2  ;;  %v55_v63 = vadd.f32 %v54_v45, %v53_v38 }
  0x33   :  { %v85_v56 = vrot.slane %v84_v50, 2  ;;  %v108_v57 = vadd.f32 %v107_v52, %v106_v44  ;;  %v102_v59 = vrot.slane %v101_v51, 2  ;;  %v79_v3 = vadd.f32 %v78_v49, %v77_v41 }
  0x34   :  { %v125_v60 = vadd.f32 %v124_v53, %v123_v47  ;;  %v131_v61 = vrot.slane %v130_v54, 4  ;;  %v62_v6 = vadd.f32 %v61_v55, %v60_v46  ;;  %v56_v11 = vrot.slane %v55_v63, 1 }
  0x35   :  { %v109_v4 = vrot.slane %v108_v57, 2  ;;  %v86_v7 = vadd.f32 %v85_v56, %v84_v50  ;;  %v103_v9 = vadd.f32 %v102_v59, %v101_v51  ;;  %v80_v12 = vrot.slane %v79_v3, 1 }
  0x36   :  { %v132_v5 = vadd.f32 %v131_v61, %v130_v54  ;;  %v126_v8 = vrot.slane %v125_v60, 2  ;;  %v146_v0 = vmul.f32 %v145_v14, %v284_v2  ;;  %v63_v16 = vrot.slane %v62_v6, 1 }
  0x37   :  { %v110_v15 = vadd.f32 %v109_v4, %v108_v57  ;;  %v87_v17 = vrot.slane %v86_v7, 1  ;;  %v104_v1 = vrot.slane %v103_v9, 1  ;;  %v57_v20 = vadd.f32 %v56_v11, %v55_v63 }
  0x38   :  { %v133_v13 = vrot.slane %v132_v5, 2  ;;  %v127_v18 = vadd.f32 %v126_v8, %v125_v60  ;;  %v147_v19 = vadd.f32 %v146_v0, %v143_v10  ;;  %v81_v21 = vadd.f32 %v80_v12, %v79_v3 }
  0x39   :  { %v111_v23 = vrot.slane %v110_v15, 1  ;;  %v64_v26 = vadd.f32 %v63_v16, %v62_v6  ;;  %v88_v27 = vadd.f32 %v87_v17, %v86_v7  ;;  %v105_v29 = vadd.f32 %v104_v1, %v103_v9 }
  0x3a   :  { %v134_v22 = vadd.f32 %v133_v13, %v132_v5  ;;  %v148_v24 = vrot.slane %v147_v19, 4  ;;  %v154_v25 = vmul.f32 %v147_v19, %v147_v19  ;;  %v128_v28 = vrot.slane %v127_v18, 1 }
  0x3b   :  { %v162_v2 = vsel %vm161_vm0, %v57_v20, %v81_v21  ;;  %v112_v33 = vadd.f32 %v111_v23, %v110_v15  ;;  %v170_v37 = vsel %vm161_vm0, %v64_v26, %v88_v27 }
  0x3c   :  { %v149_v30 = vadd.f32 %v148_v24, %v147_v19  ;;  %v155_v31 = vrot.slane %v154_v25, 4  ;;  %v135_v32 = vrot.slane %v134_v22, 1  ;;  %v129_v36 = vadd.f32 %v128_v28, %v127_v18 }
  0x3d   :  { %v164_v40 = vsel %vm163_vm1, %v162_v2, %v105_v29  ;;  %v171_v44 = vsel %vm163_vm1, %v170_v37, %v112_v33 }
  0x3e   :  { %v150_v34 = vrot.slane %v149_v30, 2  ;;  %v156_v35 = vadd.f32 %v155_v31, %v154_v25  ;;  %v136_v41 = vadd.f32 %v135_v32, %v134_v22  ;;  %v166_v45 = vsel %vm165_vm2, %v164_v40, %v129_v36 }
  0x40   :  { %v151_v38 = vadd.f32 %v150_v34, %v149_v30  ;;  %v157_v39 = vrot.slane %v156_v35, 2  ;;  %v172_v48 = vsel %vm165_vm2, %v171_v44, %v136_v41 }
  0x42   :  { %v152_v42 = vrot.slane %v151_v38, 1  ;;  %v158_v43 = vadd.f32 %v157_v39, %v156_v35 }
  0x44   :  { %v153_v46 = vadd.f32 %v152_v42, %v151_v38  ;;  %v159_v47 = vrot.slane %v158_v43, 1 }
  0x46   :  { %v160_v49 = vadd.f32 %v159_v47, %v158_v43  ;;  %v168_v50 = vsel %vm167_vm3, %v166_v45, %v153_v46 }
  0x47   :  { %169 = vst [vmem:[%s318_s2] sm:$0x1f] %v168_v50 }
  0x48   :  { %v173_v51 = vsel %vm167_vm3, %v172_v48, %v160_v49 }
  0x49   :  { %196 = vst [vmem:[%s318_s2 + $0x8] sm:$0x1f] %v173_v51 }
  0x4a   :  { %180 = vsyncpa [#allocation3], 1 }
  0x4b   :  { %181 = vsyncpa [#allocation4], 1 }

</bundles_post_ra>
